<compile_context>
chip_gen: v7x
topology: tpu7x:2x2x1
jax: 0.10.0
libtpu: 0.0.40
codegen_flags: <defaults>
</compile_context>

<pallas_src>
import math
import functools

import jax
import jax.numpy as jnp
from jax import lax
from jax.experimental import pallas as pl
from jax.experimental.pallas import tpu as pltpu

_MXU_DTYPE = jnp.bfloat16      # MXU operand / intermediate dtype; accumulation is f32
_LN_EPS = 1e-5


# ------------------------------ chip-aware config ------------------------------

def _chip_config():
    """VMEM budget / tile targets per chip (v7x: 64 MiB VMEM per TC, 2 TCs;
    v5e/v6e: 128 MiB VMEM, 1 TC).  Falls back to the conservative settings."""
    try:
        vmem = int(getattr(pltpu.get_tpu_info(), "vmem_capacity_bytes", 64 << 20))
    except Exception:                                  # no TPU / older API -> be safe
        vmem = 64 << 20
    small_vmem = vmem <= (64 << 20)                    # v7x-like (64 MiB per TC)
    return {
        "vmem_limit": min(vmem * 3 // 4, 96 << 20),    # ~48 MiB v7x, ~96 MiB v5e/v6e
        "multi_tc": small_vmem,                        # v7x has 2 TensorCores/chip
        "tm_target": 256 if small_vmem else 512,
        "tn_target": 512 if small_vmem else 1024,
        "tk_target": 512 if small_vmem else 1024,
    }


_CFG = _chip_config()


def _tile(dim, target, bases):
    """Largest divisor of `dim` that is <= target and a multiple of one of `bases`
    (tried in order, MXU-friendliest first); falls back to the full dim."""
    for base in bases:
        if dim > base:
            t = (min(target, dim) // base) * base
            while t >= base:
                if dim % t == 0:
                    return t
                t -= base
    return dim


def _erf(x):
    # Abramowitz & Stegun 7.1.26 polynomial erf (|err| <= 1.5e-7); uses only
    # exp/mul/where so it lowers on Mosaic for the fused exact-GELU epilogue.
    # TODO(synk): on v5e, if the GELU finalize phase is the critical slot, try lax.erf.
    z = jnp.abs(x)
    t = 1.0 / (1.0 + 0.3275911 * z)
    poly = ((((1.061405429 * t - 1.453152027) * t + 1.421413741) * t
             - 0.284496736) * t + 0.254829592) * t
    y = 1.0 - poly * jnp.exp(-z * z)
    return jnp.where(x < 0, -y, y)


def _gelu_exact(x):
    return 0.5 * x * (1.0 + _erf(x * (1.0 / math.sqrt(2.0))))


# ----------------------- fused tiled linear (+ epilogues) -----------------------

def _linear_kernel(*refs, epilogue, use_acc):
    if epilogue == "add_ln":
        x_ref, w_ref, b_ref, res_ref, g_ref, be_ref, o_ref = refs[:7]
        scratch = refs[7:]
    else:
        x_ref, w_ref, b_ref, o_ref = refs[:4]
        scratch = refs[4:]
    # The f32 output block is k-resident (out index_map ignores k) and doubles as
    # the accumulator; a VMEM f32 scratch is only allocated for bf16 outputs.
    acc_ref = scratch[0] if use_acc else o_ref

    k = pl.program_id(2)

    @pl.when(k == 0)
    def _():
        acc_ref[...] = jnp.zeros_like(acc_ref)

    # bf16 (or f32) MXU operands, f32 accumulation.
    acc_ref[...] += jnp.dot(x_ref[...].astype(w_ref.dtype), w_ref[...],
                            preferred_element_type=jnp.float32)

    @pl.when(k == pl.num_programs(2) - 1)
    def _():
        y = acc_ref[...] + b_ref[...]                        # bias (f32)
        if epilogue == "gelu":
            y = _gelu_exact(y)                               # exact (erf) GELU
        elif epilogue == "add_ln":
            z = y + res_ref[...]                             # residual add
            mu = jnp.mean(z, axis=-1, keepdims=True)
            d = z - mu
            var = jnp.mean(d * d, axis=-1, keepdims=True)    # biased var (torch LN)
            y = d * lax.rsqrt(var + _LN_EPS) * g_ref[...] + be_ref[...]
        elif epilogue == "log_softmax":
            m = jnp.max(y, axis=-1, keepdims=True)
            s = y - m
            y = s - jnp.log(jnp.sum(jnp.exp(s), axis=-1, keepdims=True))
        o_ref[...] = y.astype(o_ref.dtype)


def linear_fused(x2d, w, b, *, epilogue="none", out_dtype=jnp.float32,
                 residual=None, gamma=None, beta=None):
    """y = epilogue(x @ w + b), tiled over (M, N, K) with k-last reduction."""
    M, K = x2d.shape
    N = w.shape[1]
    use_acc = out_dtype != jnp.float32

    tm = _tile(M, _CFG["tm_target"], (16, 8))     # 16: bf16 LHS sublane packing
    if _CFG["multi_tc"] and M // tm < 2 and tm % 32 == 0:
        tm //= 2      # v7x only: expose >=2 M-blocks so both TensorCores get work

    row_reduce = epilogue in ("add_ln", "log_softmax")
    if row_reduce:
        tn = N        # row-reducing epilogues need the whole feature row per block
        # Cap tm so the (tm, N) f32 row block (+ double-buffered output) stays well
        # inside the scoped-VMEM budget (matters for realistic vocab sizes).
        max_tm = max(8, ((_CFG["vmem_limit"] // 6) // (N * 4)) // 8 * 8)
        while tm > max_tm and tm % 16 == 0:
            tm //= 2
        # TODO(synk): for very large vocab, switch the generator log-softmax to a
        # two-pass / online (running max+sum) reduction over N blocks instead.
    else:
        tn = _tile(N, _CFG["tn_target"], (256, 128))
    tk = _tile(K, _CFG["tk_target"], (256, 128))
    grid = (M // tm, N // tn, K // tk)

    in_specs = [
        pl.BlockSpec((tm, tk), lambda i, j, k: (i, k)),
        pl.BlockSpec((tk, tn), lambda i, j, k: (k, j)),
        pl.BlockSpec((1, tn), lambda i, j, k: (0, j)),        # bias sliced with j
    ]
    args = [x2d, w, b.reshape(1, N)]
    if epilogue == "add_ln":
        in_specs += [
            pl.BlockSpec((tm, tn), lambda i, j, k: (i, j)),   # residual
            pl.BlockSpec((1, tn), lambda i, j, k: (0, j)),    # gamma
            pl.BlockSpec((1, tn), lambda i, j, k: (0, j)),    # beta
        ]
        args += [residual, gamma.reshape(1, N), beta.reshape(1, N)]

    return pl.pallas_call(
        functools.partial(_linear_kernel, epilogue=epilogue, use_acc=use_acc),
        out_shape=jax.ShapeDtypeStruct((M, N), out_dtype),
        grid=grid,
        in_specs=in_specs,
        out_specs=pl.BlockSpec((tm, tn), lambda i, j, k: (i, j)),
        scratch_shapes=[pltpu.VMEM((tm, tn), jnp.float32)] if use_acc else [],
        compiler_params=pltpu.CompilerParams(
            dimension_semantics=("parallel", "parallel", "arbitrary"),
            vmem_limit_bytes=_CFG["vmem_limit"]),
    )(*args)


# ----------------------- fused attention block (one kernel) ----------------------

def _mha_core(q, kv, key_pad, *, h, causal, scale):
    """Multi-head attention for one batch row.

    q: (Sq, D), kv: (Sk, D) in the MXU dtype (shared QKV projection => K == V);
    key_pad: (1, Sk) int32 (1 where the key token is padding).
    Returns a single lane-dense (Sq, D) f32 result (heads concatenated)."""
    Sq, D = q.shape
    Sk = kv.shape[0]
    dk = D // h

    # Mask built in-kernel (no (B, S, S) f32 mask materialization / DMA).
    masked = jnp.broadcast_to(key_pad > 0, (Sq, Sk))
    if causal:
        qi = lax.broadcasted_iota(jnp.int32, (Sq, Sk), 0)
        kj = lax.broadcasted_iota(jnp.int32, (Sq, Sk), 1)
        masked = jnp.logical_or(masked, kj > qi)

    k_t = kv.T     # ONE up-front transpose; per-head score matmuls are then plain
                   # (Sq,dk)x(dk,Sk) contractions (no per-head XLU transpose)
    outs = []
    for head in range(h):                     # static unroll: all heads in one call
        lo = head * dk
        s = jnp.dot(q[:, lo:lo + dk], k_t[lo:lo + dk, :],
                    preferred_element_type=jnp.float32) * scale
        s = jnp.where(masked, jnp.float32(-1e9), s)     # masked_fill_(mask, -1e9)
        s = s - jnp.max(s, axis=-1, keepdims=True)      # stable softmax, f32
        e = jnp.exp(s)
        p = e * pl.reciprocal(jnp.sum(e, axis=-1, keepdims=True), approx=True)
        outs.append(jnp.dot(p.astype(kv.dtype), kv[:, lo:lo + dk],
                            preferred_element_type=jnp.float32))
    # TODO(synk): for long S, tile over Sk with an online softmax (flash-style);
    # here the full (Sq, Sk) f32 score matrix per head is assumed to fit VMEM.
    return jnp.concatenate(outs, axis=-1)               # lane-dense (Sq, D)


def _attn_block_finish(x, attn, w, b, g, be, o_ref):
    """Out-projection + residual + LayerNorm tail of the fused attention block."""
    y = jnp.dot(attn.astype(w.dtype), w, preferred_element_type=jnp.float32) + b
    z = y + x                                            # residual (f32)
    mu = jnp.mean(z, axis=-1, keepdims=True)
    d = z - mu
    var = jnp.mean(d * d, axis=-1, keepdims=True)        # biased var (torch LN)
    o_ref[0] = d * lax.rsqrt(var + _LN_EPS) * g + be     # single lane-dense store


def _self_attn_block_kernel(x_ref, w_ref, b_ref, g_ref, be_ref, pad_ref, o_ref,
                            *, h, causal, scale):
    x = x_ref[0]                                         # (S, D) f32 residual stream
    w = w_ref[...]
    b = b_ref[...]
    # Shared Q/K/V projection computed ONCE (q == k == v for self-attention).
    qkv = (jnp.dot(x.astype(w.dtype), w, preferred_element_type=jnp.float32)
           + b).astype(w.dtype)
    a = _mha_core(qkv, qkv, pad_ref[0], h=h, causal=causal, scale=scale)
    _attn_block_finish(x, a, w, b, g_ref[...], be_ref[...], o_ref)


def _cross_attn_block_kernel(x_ref, kv_ref, w_ref, b_ref, g_ref, be_ref, pad_ref,
                             o_ref, *, h, causal, scale):
    x = x_ref[0]                                         # (Sq, D) f32
    w = w_ref[...]
    b = b_ref[...]
    q = (jnp.dot(x.astype(w.dtype), w, preferred_element_type=jnp.float32)
         + b).astype(w.dtype)
    a = _mha_core(q, kv_ref[0], pad_ref[0], h=h, causal=causal, scale=scale)
    _attn_block_finish(x, a, w, b, g_ref[...], be_ref[...], o_ref)


def attention_block(x, kv, key_pad, p, *, causal):
    """Fused attention block: shared QKV projection -> multi-head attention ->
    out-projection -> residual add -> LayerNorm, one kernel per batch row.

    x: (B, Sq, D) f32 residual stream.  kv: None for self-attention (q == k == v),
    or a pre-projected (B, Sk, D) bf16 slab for cross-attention (shared weights =>
    the memory K/V projection is identical for every decoder layer).
    key_pad: (B, 1, Sk) int32."""
    B, Sq, D = x.shape
    h = p["h"]
    scale = 1.0 / math.sqrt(D // h)
    self_attn = kv is None
    Sk = Sq if self_attn else kv.shape[1]

    in_specs = [pl.BlockSpec((1, Sq, D), lambda bb: (bb, 0, 0))]
    args = [x]
    if not self_attn:
        in_specs.append(pl.BlockSpec((1, Sk, D), lambda bb: (bb, 0, 0)))
        args.append(kv)
    in_specs += [
        pl.BlockSpec((D, D), lambda bb: (0, 0)),          # shared QKV/out weight
        pl.BlockSpec((1, D), lambda bb: (0, 0)),          # shared bias
        pl.BlockSpec((1, D), lambda bb: (0, 0)),          # LayerNorm gamma
        pl.BlockSpec((1, D), lambda bb: (0, 0)),          # LayerNorm beta
        pl.BlockSpec((1, 1, Sk), lambda bb: (bb, 0, 0)),  # key-padding indicators
    ]
    args += [p["attn_w"], p["attn_b"].reshape(1, D),
             p["ln_g"].reshape(1, D), p["ln_b"].reshape(1, D), key_pad]

    kern = _self_attn_block_kernel if self_attn else _cross_attn_block_kernel
    # TODO(synk): on v7x with B < 2 (or very long S), add a second parallel grid
    # axis over Sq tiles so both TensorCores have work and per-step VMEM is bounded.
    return pl.pallas_call(
        functools.partial(kern, h=h, causal=causal, scale=scale),
        out_shape=jax.ShapeDtypeStruct((B, Sq, D), jnp.float32),
        grid=(B,),
        in_specs=in_specs,
        out_specs=pl.BlockSpec((1, Sq, D), lambda bb: (bb, 0, 0)),
        compiler_params=pltpu.CompilerParams(
            dimension_semantics=("parallel",),
            vmem_limit_bytes=_CFG["vmem_limit"]),
    )(*args)


# -------------------------- model (glue around kernels) -------------------------

def encoder_layer(x, p, key_pad):
    B, S, D = x.shape
    # fused: shared QKV proj -> MHA -> out-proj -> +x -> LayerNorm (one kernel)
    x = attention_block(x, None, key_pad, p, causal=False)
    x2d = x.reshape(-1, D)
    h1 = linear_fused(x2d, p["w1"], p["b1"], epilogue="gelu",
                      out_dtype=_MXU_DTYPE)                           # FFN1 + GELU
    y = linear_fused(h1, p["w2"], p["b2"], epilogue="add_ln",         # FFN2 + add + LN
                     residual=x2d, gamma=p["ln_g"], beta=p["ln_b"])
    return y.reshape(B, S, D)


def decoder_layer(x, mem_kv, p, self_key_pad, mem_key_pad):
    B, S, D = x.shape
    x = attention_block(x, None, self_key_pad, p, causal=True)        # masked self-attn
    x = attention_block(x, mem_kv, mem_key_pad, p, causal=False)      # cross-attn
    x2d = x.reshape(-1, D)
    h1 = linear_fused(x2d, p["w1"], p["b1"], epilogue="gelu",
                      out_dtype=_MXU_DTYPE)
    y = linear_fused(h1, p["w2"], p["b2"], epilogue="add_ln",
                     residual=x2d, gamma=p["ln_g"], beta=p["ln_b"])
    return y.reshape(B, S, D)


def transformer_forward(params, x_tok, o_tok):
    B, S = x_tok.shape
    D = params["d_model"]
    pad_idx = 1

    # (B, 1, S) key-padding indicators; the (B, S, S) masks are built in-kernel.
    enc_key_pad = (x_tok == pad_idx).astype(jnp.int32).reshape(B, 1, S)
    dec_key_pad = (o_tok == pad_idx).astype(jnp.int32).reshape(B, 1, S)

    scale = math.sqrt(D)
    x = jnp.take(params["inp_emb"], x_tok, axis=0) * scale + params["pe"]
    for _ in range(params["N"]):                        # weight-shared layers
        x = encoder_layer(x, params["enc"], enc_key_pad)
    memory = x

    dec = params["dec"]
    # Shared weights + fixed memory => the cross-attention K/V projection is
    # identical for every decoder layer; compute it once (bf16 slab).
    mem_kv = linear_fused(memory.reshape(-1, D), dec["attn_w"], dec["attn_b"],
                          out_dtype=_MXU_DTYPE).reshape(B, S, D)

    o = jnp.take(params["targ_emb"], o_tok, axis=0) * scale + params["pe"]
    for _ in range(params["N"]):
        o = decoder_layer(o, mem_kv, dec, dec_key_pad, enc_key_pad)

    # Generator: linear + log_softmax fused in a single kernel.
    out = linear_fused(o.reshape(-1, D), params["gen_w"], params["gen_b"],
                       epilogue="log_softmax")
    return out.reshape(B, S, params["targ_vocab"])


# ----------------------------------- parameters ----------------------------------

def xavier_uniform(key, shape):
    bound = math.sqrt(6.0 / (shape[0] + shape[1]))
    return jax.random.uniform(key, shape, jnp.float32, -bound, bound)


def make_params(key, *, N, d_model, h, d_ff, in_vocab, targ_vocab, max_len):
    keys = jax.random.split(key, 9)

    def layer_params(k0, k1, k2):
        return {
            "h": h,
            # matmul weights stored in the MXU dtype (halves weight DMA for bf16)
            "attn_w": xavier_uniform(k0, (d_model, d_model)).astype(_MXU_DTYPE),
            "attn_b": jnp.zeros((d_model,), jnp.float32),
            "w1": xavier_uniform(k1, (d_model, d_ff)).astype(_MXU_DTYPE),
            "b1": jnp.zeros((d_ff,), jnp.float32),
            "w2": xavier_uniform(k2, (d_ff, d_model)).astype(_MXU_DTYPE),
            "b2": jnp.zeros((d_model,), jnp.float32),
            "ln_g": jnp.ones((d_model,), jnp.float32),
            "ln_b": jnp.zeros((d_model,), jnp.float32),
        }

    pos = jnp.arange(max_len, dtype=jnp.float32)[:, None]
    div = jnp.exp(jnp.arange(0, d_model, 2, dtype=jnp.float32)
                  * (-math.log(10000.0) / d_model))
    pe = jnp.zeros((max_len, d_model), jnp.float32)
    pe = pe.at[:, 0::2].set(jnp.sin(pos * div))
    pe = pe.at[:, 1::2].set(jnp.cos(pos * div))

    return {
        "N": N, "d_model": d_model, "targ_vocab": targ_vocab,
        "inp_emb": xavier_uniform(keys[0], (in_vocab, d_model)),
        "targ_emb": xavier_uniform(keys[1], (targ_vocab, d_model)),
        "pe": pe[None],                       # x + pe un-sliced => max_len == S
        "enc": layer_params(keys[2], keys[3], keys[4]),
        "dec": layer_params(keys[5], keys[6], keys[7]),
        "gen_w": xavier_uniform(keys[8], (d_model, targ_vocab)).astype(_MXU_DTYPE),
        "gen_b": jnp.zeros((targ_vocab,), jnp.float32),
    }


# -------------------------------------- main --------------------------------------

if __name__ == "__main__":
    B, S = 2, 8
    d_model, h, d_ff = 32, 4, 64
    in_vocab = targ_vocab = 64
    N = 2                          # small stack (module default is 6, weight-shared)

    key = jax.random.PRNGKey(0)
    pkey, xkey, okey = jax.random.split(key, 3)
    params = make_params(pkey, N=N, d_model=d_model, h=h, d_ff=d_ff,
                         in_vocab=in_vocab, targ_vocab=targ_vocab, max_len=S)

    x_tok = jax.random.randint(xkey, (B, S), 2, in_vocab, dtype=jnp.int32)
    o_tok = jax.random.randint(okey, (B, S), 2, targ_vocab, dtype=jnp.int32)
    x_tok = x_tok.at[:, -2:].set(1)    # pad tokens (pad_idx=1) to exercise masking
    o_tok = o_tok.at[:, -1:].set(1)

    out = transformer_forward(params, x_tok, o_tok)
    jax.block_until_ready(out)
    assert out.shape == (B, S, targ_vocab) and out.dtype == jnp.float32
    print("KERNEL_OK")
</pallas_src>

<mosaic_0001>
module attributes {stable_mosaic.version = 11 : i64} {
  func.func @_self_attn_block_kernel(%arg0: i32, %arg1: memref<1x8x32xf32, #tpu.memory_space<vmem>>, %arg2: memref<32x32xbf16, #tpu.memory_space<vmem>>, %arg3: memref<1x32xf32, #tpu.memory_space<vmem>>, %arg4: memref<1x32xf32, #tpu.memory_space<vmem>>, %arg5: memref<1x32xf32, #tpu.memory_space<vmem>>, %arg6: memref<1x1x8xi32, #tpu.memory_space<vmem>>, %arg7: memref<1x8x32xf32, #tpu.memory_space<vmem>>) attributes {dimension_semantics = [#tpu.dimension_semantics<parallel>], iteration_bounds = array<i64: 2>, scalar_prefetch = 0 : i64, scratch_operands = 0 : i64, tpu.core_type = #tpu.core_type<tc>, window_params = [{transform_indices = @transform_0, window_bounds = array<i64: 1, 8, 32>}, {pipeline_mode = #tpu.pipeline_mode<synchronous>, transform_indices = @transform_1, window_bounds = array<i64: 32, 32>}, {pipeline_mode = #tpu.pipeline_mode<synchronous>, transform_indices = @transform_2, window_bounds = array<i64: 1, 32>}, {pipeline_mode = #tpu.pipeline_mode<synchronous>, transform_indices = @transform_3, window_bounds = array<i64: 1, 32>}, {pipeline_mode = #tpu.pipeline_mode<synchronous>, transform_indices = @transform_4, window_bounds = array<i64: 1, 32>}, {transform_indices = @transform_5, window_bounds = array<i64: 1, 1, 8>}, {transform_indices = @transform_6, window_bounds = array<i64: 1, 8, 32>}]} {
    %c0 = arith.constant 0 : index
    %c0_0 = arith.constant 0 : index
    %c0_1 = arith.constant 0 : index
    %0 = vector.load %arg1[%c0, %c0_0, %c0_1] : memref<1x8x32xf32, #tpu.memory_space<vmem>>, vector<1x8x32xf32>
    %1 = vector.shape_cast %0 : vector<1x8x32xf32> to vector<8x32xf32>
    %c0_2 = arith.constant 0 : index
    %c0_3 = arith.constant 0 : index
    %2 = vector.load %arg2[%c0_2, %c0_3] : memref<32x32xbf16, #tpu.memory_space<vmem>>, vector<32x32xbf16>
    %c0_4 = arith.constant 0 : index
    %c0_5 = arith.constant 0 : index
    %3 = vector.load %arg3[%c0_4, %c0_5] : memref<1x32xf32, #tpu.memory_space<vmem>>, vector<1x32xf32>
    %4 = arith.truncf %1 : vector<8x32xf32> to vector<8x32xbf16>
    %cst = arith.constant dense<0.000000e+00> : vector<8x32xf32>
    %5 = tpu.matmul %4, %2, %cst {dimension_numbers = #tpu.dot_dimension_numbers<[1], [0], [0], [1], [0, 0, 1, 1], [], []>} : vector<8x32xbf16>, vector<32x32xbf16>, vector<8x32xf32> -> vector<8x32xf32>
    %6 = vector.broadcast %3 : vector<1x32xf32> to vector<8x32xf32>
    %7 = arith.addf %5, %6 : vector<8x32xf32>
    %8 = arith.truncf %7 : vector<8x32xf32> to vector<8x32xbf16>
    %c0_6 = arith.constant 0 : index
    %c0_7 = arith.constant 0 : index
    %c0_8 = arith.constant 0 : index
    %9 = vector.load %arg6[%c0_6, %c0_7, %c0_8] : memref<1x1x8xi32, #tpu.memory_space<vmem>>, vector<1x1x8xi32>
    %10 = vector.shape_cast %9 : vector<1x1x8xi32> to vector<1x8xi32>
    %c0_i32 = arith.constant 0 : i32
    %11 = vector.broadcast %c0_i32 : i32 to vector<1x8xi32>
    %12 = arith.cmpi sgt, %10, %11 : vector<1x8xi32>
    %13 = vector.shape_cast %12 : vector<1x8xi1> to vector<1x8xi1>
    %14 = vector.broadcast %13 : vector<1x8xi1> to vector<8x8xi1>
    %15 = tpu.transpose %8, [1, 0] : vector<8x32xbf16> -> vector<32x8xbf16>
    %16 = vector.extract_strided_slice %8 {offsets = [0, 0], sizes = [8, 8], strides = [1, 1]} : vector<8x32xbf16> to vector<8x8xbf16>
    %17 = vector.extract_strided_slice %15 {offsets = [0, 0], sizes = [8, 8], strides = [1, 1]} : vector<32x8xbf16> to vector<8x8xbf16>
    %cst_9 = arith.constant dense<0.000000e+00> : vector<8x8xf32>
    %18 = tpu.matmul %16, %17, %cst_9 {dimension_numbers = #tpu.dot_dimension_numbers<[1], [0], [0], [1], [0, 0, 1, 1], [], []>} : vector<8x8xbf16>, vector<8x8xbf16>, vector<8x8xf32> -> vector<8x8xf32>
    %cst_10 = arith.constant 0.353553385 : f32
    %19 = vector.broadcast %cst_10 : f32 to vector<8x8xf32>
    %20 = arith.mulf %18, %19 : vector<8x8xf32>
    %cst_11 = arith.constant -1.000000e+09 : f32
    %21 = vector.broadcast %cst_11 : f32 to vector<8x8xf32>
    %22 = arith.select %14, %21, %20 : vector<8x8xi1>, vector<8x8xf32>
    %cst_12 = arith.constant dense<0xFF800000> : vector<8xf32>
    %23 = vector.multi_reduction <maximumf>, %22, %cst_12 [1] : vector<8x8xf32> to vector<8xf32>
    %24 = vector.shape_cast %23 : vector<8xf32> to vector<8x1xf32>
    %25 = vector.broadcast %24 : vector<8x1xf32> to vector<8x8xf32>
    %26 = arith.subf %22, %25 : vector<8x8xf32>
    %27 = math.exp %26 : vector<8x8xf32>
    %cst_13 = arith.constant dense<0.000000e+00> : vector<8xf32>
    %28 = vector.multi_reduction <add>, %27, %cst_13 [1] : vector<8x8xf32> to vector<8xf32>
    %29 = vector.shape_cast %28 : vector<8xf32> to vector<8x1xf32>
    %30 = tpu.reciprocal %29 {approx = true} : vector<8x1xf32> -> vector<8x1xf32>
    %31 = vector.broadcast %30 : vector<8x1xf32> to vector<8x8xf32>
    %32 = arith.mulf %27, %31 : vector<8x8xf32>
    %33 = arith.truncf %32 : vector<8x8xf32> to vector<8x8xbf16>
    %34 = vector.extract_strided_slice %8 {offsets = [0, 0], sizes = [8, 8], strides = [1, 1]} : vector<8x32xbf16> to vector<8x8xbf16>
    %cst_14 = arith.constant dense<0.000000e+00> : vector<8x8xf32>
    %35 = tpu.matmul %33, %34, %cst_14 {dimension_numbers = #tpu.dot_dimension_numbers<[1], [0], [0], [1], [0, 0, 1, 1], [], []>} : vector<8x8xbf16>, vector<8x8xbf16>, vector<8x8xf32> -> vector<8x8xf32>
    %36 = vector.extract_strided_slice %8 {offsets = [0, 8], sizes = [8, 8], strides = [1, 1]} : vector<8x32xbf16> to vector<8x8xbf16>
    %37 = vector.extract_strided_slice %15 {offsets = [8, 0], sizes = [8, 8], strides = [1, 1]} : vector<32x8xbf16> to vector<8x8xbf16>
    %cst_15 = arith.constant dense<0.000000e+00> : vector<8x8xf32>
    %38 = tpu.matmul %36, %37, %cst_15 {dimension_numbers = #tpu.dot_dimension_numbers<[1], [0], [0], [1], [0, 0, 1, 1], [], []>} : vector<8x8xbf16>, vector<8x8xbf16>, vector<8x8xf32> -> vector<8x8xf32>
    %cst_16 = arith.constant 0.353553385 : f32
    %39 = vector.broadcast %cst_16 : f32 to vector<8x8xf32>
    %40 = arith.mulf %38, %39 : vector<8x8xf32>
    %cst_17 = arith.constant -1.000000e+09 : f32
    %41 = vector.broadcast %cst_17 : f32 to vector<8x8xf32>
    %42 = arith.select %14, %41, %40 : vector<8x8xi1>, vector<8x8xf32>
    %cst_18 = arith.constant dense<0xFF800000> : vector<8xf32>
    %43 = vector.multi_reduction <maximumf>, %42, %cst_18 [1] : vector<8x8xf32> to vector<8xf32>
    %44 = vector.shape_cast %43 : vector<8xf32> to vector<8x1xf32>
    %45 = vector.broadcast %44 : vector<8x1xf32> to vector<8x8xf32>
    %46 = arith.subf %42, %45 : vector<8x8xf32>
    %47 = math.exp %46 : vector<8x8xf32>
    %cst_19 = arith.constant dense<0.000000e+00> : vector<8xf32>
    %48 = vector.multi_reduction <add>, %47, %cst_19 [1] : vector<8x8xf32> to vector<8xf32>
    %49 = vector.shape_cast %48 : vector<8xf32> to vector<8x1xf32>
    %50 = tpu.reciprocal %49 {approx = true} : vector<8x1xf32> -> vector<8x1xf32>
    %51 = vector.broadcast %50 : vector<8x1xf32> to vector<8x8xf32>
    %52 = arith.mulf %47, %51 : vector<8x8xf32>
    %53 = arith.truncf %52 : vector<8x8xf32> to vector<8x8xbf16>
    %54 = vector.extract_strided_slice %8 {offsets = [0, 8], sizes = [8, 8], strides = [1, 1]} : vector<8x32xbf16> to vector<8x8xbf16>
    %cst_20 = arith.constant dense<0.000000e+00> : vector<8x8xf32>
    %55 = tpu.matmul %53, %54, %cst_20 {dimension_numbers = #tpu.dot_dimension_numbers<[1], [0], [0], [1], [0, 0, 1, 1], [], []>} : vector<8x8xbf16>, vector<8x8xbf16>, vector<8x8xf32> -> vector<8x8xf32>
    %56 = vector.extract_strided_slice %8 {offsets = [0, 16], sizes = [8, 8], strides = [1, 1]} : vector<8x32xbf16> to vector<8x8xbf16>
    %57 = vector.extract_strided_slice %15 {offsets = [16, 0], sizes = [8, 8], strides = [1, 1]} : vector<32x8xbf16> to vector<8x8xbf16>
    %cst_21 = arith.constant dense<0.000000e+00> : vector<8x8xf32>
    %58 = tpu.matmul %56, %57, %cst_21 {dimension_numbers = #tpu.dot_dimension_numbers<[1], [0], [0], [1], [0, 0, 1, 1], [], []>} : vector<8x8xbf16>, vector<8x8xbf16>, vector<8x8xf32> -> vector<8x8xf32>
    %cst_22 = arith.constant 0.353553385 : f32
    %59 = vector.broadcast %cst_22 : f32 to vector<8x8xf32>
    %60 = arith.mulf %58, %59 : vector<8x8xf32>
    %cst_23 = arith.constant -1.000000e+09 : f32
    %61 = vector.broadcast %cst_23 : f32 to vector<8x8xf32>
    %62 = arith.select %14, %61, %60 : vector<8x8xi1>, vector<8x8xf32>
    %cst_24 = arith.constant dense<0xFF800000> : vector<8xf32>
    %63 = vector.multi_reduction <maximumf>, %62, %cst_24 [1] : vector<8x8xf32> to vector<8xf32>
    %64 = vector.shape_cast %63 : vector<8xf32> to vector<8x1xf32>
    %65 = vector.broadcast %64 : vector<8x1xf32> to vector<8x8xf32>
    %66 = arith.subf %62, %65 : vector<8x8xf32>
    %67 = math.exp %66 : vector<8x8xf32>
    %cst_25 = arith.constant dense<0.000000e+00> : vector<8xf32>
    %68 = vector.multi_reduction <add>, %67, %cst_25 [1] : vector<8x8xf32> to vector<8xf32>
    %69 = vector.shape_cast %68 : vector<8xf32> to vector<8x1xf32>
    %70 = tpu.reciprocal %69 {approx = true} : vector<8x1xf32> -> vector<8x1xf32>
    %71 = vector.broadcast %70 : vector<8x1xf32> to vector<8x8xf32>
    %72 = arith.mulf %67, %71 : vector<8x8xf32>
    %73 = arith.truncf %72 : vector<8x8xf32> to vector<8x8xbf16>
    %74 = vector.extract_strided_slice %8 {offsets = [0, 16], sizes = [8, 8], strides = [1, 1]} : vector<8x32xbf16> to vector<8x8xbf16>
    %cst_26 = arith.constant dense<0.000000e+00> : vector<8x8xf32>
    %75 = tpu.matmul %73, %74, %cst_26 {dimension_numbers = #tpu.dot_dimension_numbers<[1], [0], [0], [1], [0, 0, 1, 1], [], []>} : vector<8x8xbf16>, vector<8x8xbf16>, vector<8x8xf32> -> vector<8x8xf32>
    %76 = vector.extract_strided_slice %8 {offsets = [0, 24], sizes = [8, 8], strides = [1, 1]} : vector<8x32xbf16> to vector<8x8xbf16>
    %77 = vector.extract_strided_slice %15 {offsets = [24, 0], sizes = [8, 8], strides = [1, 1]} : vector<32x8xbf16> to vector<8x8xbf16>
    %cst_27 = arith.constant dense<0.000000e+00> : vector<8x8xf32>
    %78 = tpu.matmul %76, %77, %cst_27 {dimension_numbers = #tpu.dot_dimension_numbers<[1], [0], [0], [1], [0, 0, 1, 1], [], []>} : vector<8x8xbf16>, vector<8x8xbf16>, vector<8x8xf32> -> vector<8x8xf32>
    %cst_28 = arith.constant 0.353553385 : f32
    %79 = vector.broadcast %cst_28 : f32 to vector<8x8xf32>
    %80 = arith.mulf %78, %79 : vector<8x8xf32>
    %cst_29 = arith.constant -1.000000e+09 : f32
    %81 = vector.broadcast %cst_29 : f32 to vector<8x8xf32>
    %82 = arith.select %14, %81, %80 : vector<8x8xi1>, vector<8x8xf32>
    %cst_30 = arith.constant dense<0xFF800000> : vector<8xf32>
    %83 = vector.multi_reduction <maximumf>, %82, %cst_30 [1] : vector<8x8xf32> to vector<8xf32>
    %84 = vector.shape_cast %83 : vector<8xf32> to vector<8x1xf32>
    %85 = vector.broadcast %84 : vector<8x1xf32> to vector<8x8xf32>
    %86 = arith.subf %82, %85 : vector<8x8xf32>
    %87 = math.exp %86 : vector<8x8xf32>
    %cst_31 = arith.constant dense<0.000000e+00> : vector<8xf32>
    %88 = vector.multi_reduction <add>, %87, %cst_31 [1] : vector<8x8xf32> to vector<8xf32>
    %89 = vector.shape_cast %88 : vector<8xf32> to vector<8x1xf32>
    %90 = tpu.reciprocal %89 {approx = true} : vector<8x1xf32> -> vector<8x1xf32>
    %91 = vector.broadcast %90 : vector<8x1xf32> to vector<8x8xf32>
    %92 = arith.mulf %87, %91 : vector<8x8xf32>
    %93 = arith.truncf %92 : vector<8x8xf32> to vector<8x8xbf16>
    %94 = vector.extract_strided_slice %8 {offsets = [0, 24], sizes = [8, 8], strides = [1, 1]} : vector<8x32xbf16> to vector<8x8xbf16>
    %cst_32 = arith.constant dense<0.000000e+00> : vector<8x8xf32>
    %95 = tpu.matmul %93, %94, %cst_32 {dimension_numbers = #tpu.dot_dimension_numbers<[1], [0], [0], [1], [0, 0, 1, 1], [], []>} : vector<8x8xbf16>, vector<8x8xbf16>, vector<8x8xf32> -> vector<8x8xf32>
    %96 = tpu.concatenate %35, %55, %75, %95 in 1 : vector<8x8xf32>, vector<8x8xf32>, vector<8x8xf32>, vector<8x8xf32> -> vector<8x32xf32>
    %c0_33 = arith.constant 0 : index
    %c0_34 = arith.constant 0 : index
    %97 = vector.load %arg4[%c0_33, %c0_34] : memref<1x32xf32, #tpu.memory_space<vmem>>, vector<1x32xf32>
    %c0_35 = arith.constant 0 : index
    %c0_36 = arith.constant 0 : index
    %98 = vector.load %arg5[%c0_35, %c0_36] : memref<1x32xf32, #tpu.memory_space<vmem>>, vector<1x32xf32>
    %99 = arith.truncf %96 : vector<8x32xf32> to vector<8x32xbf16>
    %cst_37 = arith.constant dense<0.000000e+00> : vector<8x32xf32>
    %100 = tpu.matmul %99, %2, %cst_37 {dimension_numbers = #tpu.dot_dimension_numbers<[1], [0], [0], [1], [0, 0, 1, 1], [], []>} : vector<8x32xbf16>, vector<32x32xbf16>, vector<8x32xf32> -> vector<8x32xf32>
    %101 = vector.broadcast %3 : vector<1x32xf32> to vector<8x32xf32>
    %102 = arith.addf %100, %101 : vector<8x32xf32>
    %103 = arith.addf %102, %1 : vector<8x32xf32>
    %cst_38 = arith.constant dense<0.000000e+00> : vector<8xf32>
    %104 = vector.multi_reduction <add>, %103, %cst_38 [1] : vector<8x32xf32> to vector<8xf32>
    %105 = vector.shape_cast %104 : vector<8xf32> to vector<8x1xf32>
    %cst_39 = arith.constant 3.200000e+01 : f32
    %106 = vector.broadcast %cst_39 : f32 to vector<8x1xf32>
    %107 = arith.divf %105, %106 : vector<8x1xf32>
    %108 = vector.broadcast %107 : vector<8x1xf32> to vector<8x32xf32>
    %109 = arith.subf %103, %108 : vector<8x32xf32>
    %110 = arith.mulf %109, %109 : vector<8x32xf32>
    %cst_40 = arith.constant dense<0.000000e+00> : vector<8xf32>
    %111 = vector.multi_reduction <add>, %110, %cst_40 [1] : vector<8x32xf32> to vector<8xf32>
    %112 = vector.shape_cast %111 : vector<8xf32> to vector<8x1xf32>
    %cst_41 = arith.constant 3.200000e+01 : f32
    %113 = vector.broadcast %cst_41 : f32 to vector<8x1xf32>
    %114 = arith.divf %112, %113 : vector<8x1xf32>
    %cst_42 = arith.constant 9.99999974E-6 : f32
    %115 = vector.broadcast %cst_42 : f32 to vector<8x1xf32>
    %116 = arith.addf %114, %115 : vector<8x1xf32>
    %117 = math.rsqrt %116 : vector<8x1xf32>
    %118 = vector.broadcast %117 : vector<8x1xf32> to vector<8x32xf32>
    %119 = arith.mulf %109, %118 : vector<8x32xf32>
    %120 = vector.broadcast %97 : vector<1x32xf32> to vector<8x32xf32>
    %121 = arith.mulf %119, %120 : vector<8x32xf32>
    %122 = vector.broadcast %98 : vector<1x32xf32> to vector<8x32xf32>
    %123 = arith.addf %121, %122 : vector<8x32xf32>
    %c0_43 = arith.constant 0 : index
    %c0_44 = arith.constant 0 : index
    %c0_45 = arith.constant 0 : index
    %124 = vector.load %arg7[%c0_43, %c0_44, %c0_45] : memref<1x8x32xf32, #tpu.memory_space<vmem>>, vector<1x8x32xf32>
    %125 = vector.shape_cast %124 : vector<1x8x32xf32> to vector<8x32xf32>
    %126 = vector.shape_cast %123 : vector<8x32xf32> to vector<1x8x32xf32>
    tpu.vector_store %arg7[%c0_43, %c0_44, %c0_45], %126 {strides = array<i32>} : memref<1x8x32xf32, #tpu.memory_space<vmem>>, vector<1x8x32xf32>,
    return
  }
  func.func @transform_0(%arg0: i32) -> (i32, i32, i32) {
    %c0_i32 = arith.constant 0 : i32
    %c0_i32_0 = arith.constant 0 : i32
    %c0_i32_1 = arith.constant 0 : i32
    return %arg0, %c0_i32, %c0_i32_0 : i32, i32, i32
  }
  func.func @transform_1(%arg0: i32) -> (i32, i32) {
    %c0_i32 = arith.constant 0 : i32
    %c0_i32_0 = arith.constant 0 : i32
    %c0_i32_1 = arith.constant 0 : i32
    return %c0_i32, %c0_i32_0 : i32, i32
  }
  func.func @transform_2(%arg0: i32) -> (i32, i32) {
    %c0_i32 = arith.constant 0 : i32
    %c0_i32_0 = arith.constant 0 : i32
    %c0_i32_1 = arith.constant 0 : i32
    return %c0_i32, %c0_i32_0 : i32, i32
  }
  func.func @transform_3(%arg0: i32) -> (i32, i32) {
    %c0_i32 = arith.constant 0 : i32
    %c0_i32_0 = arith.constant 0 : i32
    %c0_i32_1 = arith.constant 0 : i32
    return %c0_i32, %c0_i32_0 : i32, i32
  }
  func.func @transform_4(%arg0: i32) -> (i32, i32) {
    %c0_i32 = arith.constant 0 : i32
    %c0_i32_0 = arith.constant 0 : i32
    %c0_i32_1 = arith.constant 0 : i32
    return %c0_i32, %c0_i32_0 : i32, i32
  }
  func.func @transform_5(%arg0: i32) -> (i32, i32, i32) {
    %c0_i32 = arith.constant 0 : i32
    %c0_i32_0 = arith.constant 0 : i32
    %c0_i32_1 = arith.constant 0 : i32
    return %arg0, %c0_i32, %c0_i32_0 : i32, i32, i32
  }
  func.func @transform_6(%arg0: i32) -> (i32, i32, i32) {
    %c0_i32 = arith.constant 0 : i32
    %c0_i32_0 = arith.constant 0 : i32
    %c0_i32_1 = arith.constant 0 : i32
    return %arg0, %c0_i32, %c0_i32_0 : i32, i32, i32
  }
}

</mosaic_0001>

<bundles_post_ra>
// kernel: tpu_custom_call.1
= control target key start
LH: loop header
LB: loop body
LE: loop exit
PB: predicated region body
PF: predicated region fallthrough
CT: control target
= control target key end

     0   :  { %11 = vsyncpa [#allocation3], 0  ;;  %s1674_s0 = inlined_call_operand.hbm [shape: f32[2,8,32], index: 0, kind: input, shape index: {}]   ;;  %s1675_s1 = inlined_call_operand.hbm [shape: bf16[32,32], index: 1, kind: input, shape index: {}]   ;;  %s1676_s2 = inlined_call_operand.vmem [shape: f32[1,32], index: 2, kind: input, shape index: {}]   ;;  %s1677_s3 = inlined_call_operand.vmem [shape: f32[1,32], index: 3, kind: input, shape index: {}]   ;;  %s1678_s4 = inlined_call_operand.vmem [shape: f32[1,32], index: 4, kind: input, shape index: {}]   ;;  %s1679_s5 = inlined_call_operand.vmem [shape: s32[2,1,8], index: 5, kind: input, shape index: {}]   ;;  %s1680_s6 = inlined_call_operand.hbm [shape: f32[2,8,32], index: 6, kind: output, shape index: {}]  }
   0x1   :  { %13 = vsyncpa [#allocation3 + $0x1], 0 }
   0x2   :  { %14 = vsyncpa [#allocation6], 0 }
   0x3   :  { %15 = vsyncpa [#allocation4], 0 }
   0x4   :  { %17 = vsyncpa [#allocation4 + $0x1], 0  ;;  %s1370_s21 = smov 0   ;;  %s1372_s22 = smov 0  }
   0x5   :  { %s1374_s23 = smov 0   ;;  %s1376_s24 = smov 0  }
   0x6 LB: > { %s1391_s25 = sadd.s32 4294967295, %s1319_s24   ;;  %s988_s26 = sadd.s32 4294967294, %s1319_s24   ;;  %s1319_s24 = sphi %s1376_s24, %s1700_s24   ;;  %s1315_s23 = sphi %s1374_s23, %s1699_s23   ;;  %s1311_s22 = sphi %s1372_s22, %s1698_s22   ;;  %s1307_s21 = sphi %s1370_s21, %s1697_s21  }
   0x7   : > { %p43_p0 = scmp.ne.s32.totalorder %s1311_s22, %s1307_s21  ;;  %p1681_p1 = scmp.eq.s32.totalorder %s1391_s25, 0 }
   0x8   : > { %p183_p3 = scmp.eq.s32.totalorder %s988_s26, 1  ;;  %p989_p5 = scmp.ge.s32.totalorder %s1319_s24, 1 }
   0x9   : > { %p1400_p4 = por %p1681_p1, %p43_p0  ;;  %p190_p7 = scmp.lt.s32.totalorder %s1319_s24, 3 }
   0xa   : > { %p1405_p6 = por %p183_p3, %p43_p0  ;;  %s1321_s30 = smov [#allocation5]  }
   0xb   : > { %s1684_s27 = scalar_select %p1400_p4, 1, 0 }
   0xc   : > { %s1685_s28 = scalar_select %p1405_p6, 1, 0 }
   0xd   : > { %p1410_p8 = pnand %p989_p5, %p190_p7  ;;  %s202_s7 = sshll.u32 %s1321_s30, 4  ;;  %s1414_s7 = int_to_ptr.vmem [resolvable:$true] %s202_s7 }
   0xe   : > { %s1426_s9 = sadd.s32 1, %s1319_s24   ;;  %s30_s10 = sadd.s32 1, %s1315_s23 }
   0xf   : > { %s1686_s29 = scalar_select %p1410_p8, 1, 0 }
  0x10   : > { %p1111_p9 = pneg %p1410_p8  ;;  %s27_s11 = ssub.s32 %s1319_s24, %s1426_s9 }
  0x11   : > { %s1191_s14 = scalar_lea.hbm %s1675_s1, 256 }
  0x12   : > { %p1421_p11 = pnand %p1111_p9, %p1681_p1  ;;  %p1192_p12 = scmp.ne.s32.totalorder %s1675_s1, %s1191_s14 }
  0x13   : > { %p1198_p5 = scmp.lt.u32.totalorder %s1191_s14, %s1675_s1 }
  0x14   : > { %p1193_p13 = pneg %p1421_p11 }
  0x16   : > { %p1194_p0 = pnand %p1193_p13, %p1192_p12 }
  0x18   : > { %p1195_p3 = pneg %p1194_p0 }
  0x1a   : > { %p1200_p7 = pnand %p1198_p5, %p1195_p3 }
  0x1c   : > { %1203 = shalt.err (!%p1200_p7)
}
  0x1d   : > { %s1204_s19 = scalar_lea.vmem %s1414_s7, 256  ;;  %p1212_p2 = scmp.lt.s32.totalorder %s1414_s7, %s1414_s7 }
  0x1e   : > { %p1205_p9 = scmp.ne.s32.totalorder %s1414_s7, %s1204_s19  ;;  %p1213_p6 = scmp.lt.s32.totalorder %s1204_s19, %s1204_s19 }
  0x20   : > { %p1207_p10 = pnand %p1205_p9, %p1193_p13  ;;  %p1214_p4 = por %p1213_p6, %p1212_p2 }
  0x22   : > { %p1208_p1 = pneg %p1207_p10 }
  0x24   : > { %p1215_p8 = pnand %p1214_p4, %p1208_p1 }
  0x26   : > { %1218 = shalt.err (!%p1215_p8)
}
  0x27   : > { %s1322_s20 = smov 64   ;;  %s1323_s26 = smov 4  }
  0x28   : > { %1114 = dma.hbm_to_vmem [thread:$0]  (!%p1421_p11), %s1675_s1, 256, %s1414_s7, [#allocation6], %s1322_s20, %s1322_s20, %s1323_s26  }
  0x29   : > { %p28_p2 = scmp.eq.s32.totalorder %s27_s11, 0  ;;  %p37_p1 = scmp.ne.s32.totalorder %s1315_s23, %s1311_s22 }
  0x2a   : > { %p38_p4 = scmp.eq.s32.totalorder %s1319_s24, 0  ;;  %p1124_p6 = scmp.lt.s32.totalorder %s1319_s24, 2 }
  0x2b   : > { %s1457_s13 = scalar_select %p28_p2, %s1315_s23, %s30_s10  }
  0x2c   : > { %p39_p8 = por %p38_p4, %p37_p1  ;;  %p1688_p10 = scmp.eq.s32.totalorder %s1391_s25, 1 }
  0x2d   : > { %s225_s15 = sand.u32 1, %s1315_s23   ;;  %s993_s16 = sshll.u32 %s1319_s24, 7 }
  0x2e   : > { %p1461_p12 = por %p1688_p10, %p37_p1  ;;  %s992_s17 = sshll.u32 %s225_s15, 3 }
  0x2f   : > { %s1470_s19 = scalar_lea.hbm %s1674_s0, %s993_s16  ;;  %s229_s7 = scalar_lea.vmem [#allocation2], %s992_s17 }
  0x30   : > { %s236_s10 = sshll.u32 %s229_s7, 4  ;;  %p1472_p11 = pnand %p1124_p6, %p39_p8  ;;  %s1476_s10 = int_to_ptr.vmem [resolvable:$true] %s236_s10 }
  0x31   : > { %s226_s20 = scalar_lea.sflag [#allocation3], %s225_s15  ;;  %s1219_s26 = scalar_lea.hbm %s1470_s19, 128 }
  0x32   : > { %p1220_p13 = scmp.ne.s32.totalorder %s1470_s19, %s1219_s26  ;;  %p1221_p0 = pneg %p1472_p11 }
  0x33   : > { %s1224_s16 = scalar_lea.hbm %s1674_s0, 256  ;;  %p1225_p7 = scmp.lt.u32.totalorder %s1470_s19, %s1674_s0 }
  0x34   : > { %p1222_p3 = pnand %p1221_p0, %p1220_p13  ;;  %p1226_p9 = scmp.lt.u32.totalorder %s1224_s16, %s1219_s26 }
  0x35   : > { %p1228_p1 = scmp.lt.u32.totalorder %s1219_s26, %s1470_s19 }
  0x36   : > { %p1223_p5 = pneg %p1222_p3  ;;  %p1227_p2 = por %p1226_p9, %p1225_p7 }
  0x38   : > { %p1229_p4 = por %p1228_p1, %p1227_p2 }
  0x3a   : > { %p1230_p6 = pnand %p1229_p4, %p1223_p5 }
  0x3c   : > { %1233 = shalt.err (!%p1230_p6)
}
  0x3d   : > { %s1234_s15 = scalar_lea.vmem %s1476_s10, 128  ;;  %s1324_s18 = smov [#allocation2]  }
  0x3e   : > { %p1235_p8 = scmp.ne.s32.totalorder %s1476_s10, %s1234_s15  ;;  %s1239_s7 = sshll.u32 %s1324_s18, 4  ;;  %s1240_s7 = int_to_ptr.vmem [resolvable:$false] %s1239_s7 }
  0x3f   : > { %s1241_s30 = scalar_lea.vmem %s1240_s7, 256  ;;  %p1242_p3 = scmp.lt.s32.totalorder %s1476_s10, %s1240_s7 }
  0x40   : > { %p1237_p10 = pnand %p1235_p8, %p1221_p0  ;;  %p1243_p7 = scmp.lt.s32.totalorder %s1241_s30, %s1234_s15 }
  0x42   : > { %p1238_p13 = pneg %p1237_p10  ;;  %p1244_p9 = por %p1243_p7, %p1242_p3 }
  0x44   : > { %p1245_p2 = pnand %p1244_p9, %p1238_p13 }
  0x46   : > { %1248 = shalt.err (!%p1245_p2)
}
  0x47   : > { %1118 = dma.hbm_to_vmem [thread:$0]  (!%p1472_p11), %s1470_s19, 128, %s1476_s10, %s226_s20  }
  0x48   : > { %p1691_p5 = scmp.ne.s32.totalorder %s1686_s29, 0 }
  0x49   : > { %s1506_s26 = sand.u32 (!%p1691_p5), 1, %s1311_s22   ;;  %p1692_p0 = scmp.ne.s32.totalorder (!%p1691_p5), %s1684_s27, 0 }
  0x4a   : > { %251 = sbr.rel (%p1691_p5) target bundleno = 1854 (0x73e), region = 44  ;;  %s995_s12 = sshll.u32 (!%p1691_p5), %s1506_s26, 3 }
  0x4b   : > { %s254_s16 = scalar_lea.sflag (!%p1691_p5), [#allocation3], %s1506_s26  ;;  %s257_s17 = scalar_lea.vmem (!%p1691_p5), [#allocation2], %s995_s12 }
  0x51   : > { %1294 = dma.done.wait (%p1692_p0), %s254_s16, 128  }
  0x52   : > { %1296 = vsyncadd (%p1692_p0), %s254_s16, 4294967168  ;;  %p1693_p11 = scmp.eq.s32.totalorder %s1391_s25, 0 }
  0x54   : > { %1298 = dma.done.wait (%p1693_p11), [#allocation6], 256   ;;  %p1694_p1 = pmov %p1693_p11 }
  0x55   : > { %v1325_v0 = vmov 0.0   ;;  %vm1326_vm0 = vmmov 0   ;;  %v1171_v1 = vld [vmem:[#allocation5] sm:$0xff]   ;;  %v1172_v2 = vld [vmem:[#allocation5 + $0x8] sm:$0xff]   ;;  %v1526_v3 = vld [vmem:[%s257_s17] sm:$0xff]  ;;  %vm322_vm1 = vcmask 261120   ;;  %v370_v20 = vlaneseq }
  0x56   : > { %1300 = vsyncadd (%p1694_p1), [#allocation6], 4294967040  ;;  %1039 = vmatprep.subr.bf16.mxu0 %v1325_v0  ;;  %1043 = vmatprep.mubr.msk.bf16.mxu0 %vm1326_vm0, %v1325_v0  ;;  %v303_v4 = vpack.c.bf16 %v1526_v3, %v1526_v3  ;;  %v1538_v5 = vld [vmem:[%s1676_s2] ss:$0 sm:$0xff]  ;;  %vm375_vm2 = vcmask 64512   ;;  %vm436_vm3 = vcmask 1043456  }
  0x57   : > { %1047 = vmatprep.subr.bf16.mxu1 %v1325_v0  ;;  %1049 = vmatprep.mubr.msk.bf16.mxu1 %vm1326_vm0, %v1325_v0  ;;  %s1327_s19 = smov 104   ;;  %s1328_s10 = smov 120   ;;  %v371_v22 = vshrl.u32 %v370_v20, 7  ;;  %v1330_v24 = vmov 0   ;;  %vm805_vm6 = vcmask 130048   ;;  %vm807_vm7 = vcmask 195584  }
  0x58   : > { %1040 = vmatpush3.bf16.msra.mxu0 %v1171_v1  ;;  %s1329_s11 = smov 112   ;;  %p293_p4 = scmp.lt.s32.totalorder %s1391_s25, 1 }
  0x59   : > { %1041 = vmatprep.subr.bf16.mxu0 %v1325_v0  ;;  %v372_v23 = vsub.s32 0, %v371_v22  ;;  %s1331_s7 = smov 8   ;;  %s1332_s30 = smov 16  }
  0x5a   : > { %s294_s20 = scalar_select %p293_p4, %s1391_s25, 1 }
  0x5b   : > { %s1333_s16 = smov 24  }
  0x5c   : > { %1042 = vmatpush3.bf16.msra.mxu0 %v1172_v2  ;;  %s295_s18 = scalar_lea.vmem %s1679_s5, %s294_s20 }
  0x5d   : > { %1053 = vmatprep.subr.bf16.mxu0 %v1325_v0  ;;  %v367_v21 = vld [vmem:[%s295_s18] sm:$0x1] }
  0x5e   : > { %vm368_vm4 = vcmp.gt.s32.totalorder %v367_v21, 0 }
  0x5f   : > { %1044 = vmatmul.mubr.msk.bf16.vlgmr.msra.gmra.mrb[0].mxu0 %vm322_vm1, %v303_v4  ;;  %v369_v25 = vsel %vm368_vm4, 1, %v1330_v24 }
  0x60   : > { %1055 = vmatprep.mubr.msk.bf16.mxu0 %vm1326_vm0, %v1325_v0  ;;  %v373_v26 = vrot.slane %v369_v25, %v372_v23 }
  0x62   : > { %vm374_vm5 = vcmp.eq.s32.totalorder %v373_v26, 1 }
 0x132   : > { %v360_v6 = vpop.f32.mrb[0].mxu0 }
 0x133   : > { %v361_v7 = vadd.f32 %v1538_v5, %v360_v6  ;;  %v1045_v8 = vpop.f32.mrb[1].mxu0 }
 0x134   : > { %v363_v9 = vpop.f32.mrb[2].mxu0 }
 0x135   : > { %v366_v10 = vpack.c.bf16 %v361_v7, %v361_v7  ;;  %v1046_v11 = vpop.f32.mrb[3].mxu0 }
 0x137   : > { %688 = vrot.lane.b32.xlu1 %v366_v10, %s1327_s19  ;;  %480 = vrot.lane.b32.xlu0 %v366_v10, %s1328_s10  ;;  %v377_v12 = vsel %vm375_vm2, %v366_v10, 0  ;;  %v437_v13 = vsel %vm436_vm3, %v366_v10, 0  ;;  %s1014_s10 = sshll.u32 %s1391_s25, 7  ;;  %s1334_s25 = smov [#allocation7]  }
 0x138   : > { %1048 = vmatpush3.bf16.xpose.msra.mxu1 %v377_v12  ;;  %1054 = vmatpush3.bf16.msra.mxu0 %v437_v13  ;;  %s1629_s18 = scalar_lea.hbm %s1680_s6, %s1014_s10 }
 0x139   : > { %1059 = vmatprep.subr.bf16.mxu1 %v1325_v0  ;;  %1065 = vmatprep.subr.bf16.mxu0 %v1325_v0 }
 0x13b   : > { %584 = vrot.lane.b32.xlu0 %v366_v10, %s1329_s11  ;;  %s292_s11 = scalar_lea.vmem [#allocation7], %s995_s12  ;;  %s1253_s12 = sshll.u32 %s1334_s25, 4  ;;  %s1254_s12 = int_to_ptr.vmem [resolvable:$false] %s1253_s12 }
 0x13c   : > { %s899_s20 = sshll.u32 %s292_s11, 4  ;;  %s1631_s20 = int_to_ptr.vmem [resolvable:$true] %s899_s20 }
 0x13d   : > { %p1256_p13 = scmp.lt.s32.totalorder %s1631_s20, %s1254_s12 }
 0x13f   : > { %1050 = vmatmul.mubr.msk.bf16.vlgmr.msra.gmra.mrb[0].mxu1 %vm375_vm2, %v366_v10 }
 0x140   : > { %1061 = vmatprep.mubr.msk.bf16.mxu1 %vm1326_vm0, %v1325_v0 }
 0x1a9   : > { %v1548_v14 = vpop.permute.xlu0 %480  ;;  %v1562_v18 = vpop.permute.xlu1 %688 }
 0x1aa   : > { %v483_v15 = vsel %vm375_vm2, %v1548_v14, 0  ;;  %v691_v19 = vsel %vm375_vm2, %v1562_v18, 0  ;;  %v542_v21 = vsel %vm436_vm3, %v1548_v14, 0 }
 0x1ab   : > { %1060 = vmatpush3.bf16.xpose.msra.mxu1 %v483_v15 }
 0x1ac   : > { %1071 = vmatprep.subr.bf16.mxu1 %v1325_v0 }
 0x1ad   : > { %v1553_v16 = vpop.permute.xlu0 %584 }
 0x1ae   : > { %v587_v17 = vsel %vm375_vm2, %v1553_v16, 0 }
 0x1b2   : > { %1062 = vmatmul.mubr.msk.bf16.vlgmr.msra.gmra.mrb[4].mxu1 %vm375_vm2, %v1548_v14 }
 0x1b3   : > { %1072 = vmatpush3.bf16.xpose.msra.mxu1 %v587_v17  ;;  %1073 = vmatprep.mubr.msk.bf16.mxu1 %vm1326_vm0, %v1325_v0 }
 0x1b4   : > { %1083 = vmatprep.subr.bf16.mxu1 %v1325_v0 }
 0x1ba   : > { %1074 = vmatmul.mubr.msk.bf16.vlgmr.msra.gmra.mrb[8].mxu1 %vm375_vm2, %v1553_v16 }
 0x1bb   : > { %1084 = vmatpush3.bf16.xpose.msra.mxu1 %v691_v19  ;;  %1085 = vmatprep.mubr.msk.bf16.mxu1 %vm1326_vm0, %v1325_v0 }
 0x1bc   : > { %1095 = vmatprep.subr.bf16.mxu1 %v1325_v0 }
 0x1c2   : > { %1086 = vmatmul.mubr.msk.bf16.vlgmr.msra.gmra.mrb[12].mxu1 %vm375_vm2, %v1562_v18 }
 0x1c3   : > { %1096 = vmatpush3.bf16.msra.mxu1 %v1171_v1  ;;  %1099 = vmatprep.mubr.msk.bf16.mxu1 %vm1326_vm0, %v1325_v0 }
 0x1c4   : > { %1097 = vmatprep.subr.bf16.mxu1 %v1325_v0 }
 0x1c7   : > { %1098 = vmatpush3.bf16.msra.mxu1 %v1172_v2 }
 0x212   : > { %v413_v27 = vpop.f32.mrb[0].mxu1 }
 0x213   : > { %v419_v28 = vmul.f32 0.35355338, %v413_v27  ;;  %v1051_v29 = vpop.f32.mrb[1].mxu1  ;;  %v646_v27 = vsel %vm436_vm3, %v1553_v16, 0 }
 0x214   : > { %v416_v30 = vpop.f32.mrb[2].mxu1 }
 0x215   : > { %v1052_v31 = vpop.f32.mrb[3].mxu1  ;;  %v420_v32 = vsel %vm374_vm5, -1e+09, %v419_v28 }
 0x216   : > { %v421_v33 = vsel %vm375_vm2, %v420_v32, -inf  ;;  %v750_v31 = vsel %vm436_vm3, %v1562_v18, 0 }
 0x217   : > { %422 = vmax.xlane.f32.xlu1 %v421_v33 }
 0x285   : > { %v519_v34 = vpop.f32.mrb[4].mxu1 }
 0x286   : > { %v525_v35 = vmul.f32 0.35355338, %v519_v34  ;;  %v1063_v36 = vpop.f32.mrb[5].mxu1 }
 0x287   : > { %v522_v37 = vpop.f32.mrb[6].mxu1 }
 0x288   : > { %v1064_v38 = vpop.f32.mrb[7].mxu1  ;;  %v526_v39 = vsel %vm374_vm5, -1e+09, %v525_v35 }
 0x289   : > { %v527_v40 = vsel %vm375_vm2, %v526_v39, -inf }
 0x28a   : > { %528 = vmax.xlane.f32.xlu0 %v527_v40 }
 0x28d   : > { %v623_v41 = vpop.f32.mrb[8].mxu1 }
 0x28e   : > { %v629_v42 = vmul.f32 0.35355338, %v623_v41  ;;  %v1075_v43 = vpop.f32.mrb[9].mxu1 }
 0x28f   : > { %v626_v44 = vpop.f32.mrb[10].mxu1 }
 0x290   : > { %v1076_v45 = vpop.f32.mrb[11].mxu1  ;;  %v630_v46 = vsel %vm374_vm5, -1e+09, %v629_v42 }
 0x291   : > { %v631_v47 = vsel %vm375_vm2, %v630_v46, -inf }
 0x292   : > { %632 = vmax.xlane.f32.xlu0 %v631_v47 }
 0x295   : > { %v727_v48 = vpop.f32.mrb[12].mxu1 }
 0x296   : > { %v733_v49 = vmul.f32 0.35355338, %v727_v48  ;;  %v1087_v50 = vpop.f32.mrb[13].mxu1 }
 0x297   : > { %v730_v51 = vpop.f32.mrb[14].mxu1 }
 0x298   : > { %v1088_v52 = vpop.f32.mrb[15].mxu1  ;;  %v734_v53 = vsel %vm374_vm5, -1e+09, %v733_v49 }
 0x299   : > { %v735_v54 = vsel %vm375_vm2, %v734_v53, -inf }
 0x29a   : > { %736 = vmax.xlane.f32.xlu1 %v735_v54 }
 0x2a4   : > { %v423_v55 = vpop.xlane.xlu1 %422 }
 0x2a5   : > { %v424_v56 = vsub.f32 %v420_v32, %v423_v55 }
 0x2a7   : > { %v425_v57 = vmul.f32 1.442695, %v424_v56 }
 0x2a9   : > { %1173 = vpow2.f32 %v425_v57 }
 0x2b3   : > { %v1174_v58 = vpop.eup %1173 }
 0x2b4   : > { %v427_v59 = vsel %vm375_vm2, %v1174_v58, 0.0 }
 0x2b5   : > { %428 = vadd.xlane.f32.xlu0 %v427_v59 }
 0x317   : > { %v529_v60 = vpop.xlane.xlu0 %528 }
 0x318   : > { %v530_v61 = vsub.f32 %v526_v39, %v529_v60 }
 0x31a   : > { %v531_v62 = vmul.f32 1.442695, %v530_v61 }
 0x31c   : > { %1175 = vpow2.f32 %v531_v62 }
 0x31f   : > { %v633_v63 = vpop.xlane.xlu0 %632 }
 0x320   : > { %v634_v1 = vsub.f32 %v630_v46, %v633_v63 }
 0x322   : > { %v635_v2 = vmul.f32 1.442695, %v634_v1 }
 0x324   : > { %1177 = vpow2.f32 %v635_v2 }
 0x326   : > { %v1176_v4 = vpop.eup %1175 }
 0x327   : > { %v737_v6 = vpop.xlane.xlu1 %736  ;;  %v533_v7 = vsel %vm375_vm2, %v1176_v4, 0.0 }
 0x328   : > { %v738_v8 = vsub.f32 %v734_v53, %v737_v6  ;;  %534 = vadd.xlane.f32.xlu1 %v533_v7 }
 0x32a   : > { %v739_v9 = vmul.f32 1.442695, %v738_v8 }
 0x32c   : > { %1179 = vpow2.f32 %v739_v9 }
 0x32e   : > { %v1178_v10 = vpop.eup %1177 }
 0x32f   : > { %v637_v11 = vsel %vm375_vm2, %v1178_v10, 0.0 }
 0x330   : > { %638 = vadd.xlane.f32.xlu0 %v637_v11 }
 0x336   : > { %v1180_v12 = vpop.eup %1179 }
 0x337   : > { %v741_v13 = vsel %vm375_vm2, %v1180_v12, 0.0 }
 0x338   : > { %742 = vadd.xlane.f32.xlu1 %v741_v13 }
 0x342   : > { %v429_v15 = vpop.xlane.xlu0 %428 }
 0x343   : > { %1181 = vrcp.f32 %v429_v15 }
 0x34d   : > { %v1182_v17 = vpop.eup %1181 }
 0x34e   : > { %v431_v19 = vmul.f32 %v1182_v17, %v1174_v58 }
 0x350   : > { %v432_v20 = vpack.c.bf16 %v431_v19, %v431_v19 }
 0x352   : > { %1056 = vmatmul.mubr.msk.bf16.vlgmr.msra.gmra.mrb[4].mxu0 %vm375_vm2, %v432_v20 }
 0x353   : > { %1066 = vmatpush3.bf16.msra.mxu0 %v542_v21  ;;  %1067 = vmatprep.mubr.msk.bf16.mxu0 %vm1326_vm0, %v1325_v0 }
 0x354   : > { %1077 = vmatprep.subr.bf16.mxu0 %v1325_v0 }
 0x3b5   : > { %v535_v22 = vpop.xlane.xlu1 %534 }
 0x3b6   : > { %1183 = vrcp.f32 %v535_v22 }
 0x3bd   : > { %v639_v23 = vpop.xlane.xlu0 %638 }
 0x3be   : > { %1185 = vrcp.f32 %v639_v23 }
 0x3c0   : > { %v1184_v24 = vpop.eup %1183 }
 0x3c1   : > { %v537_v25 = vmul.f32 %v1184_v24, %v1176_v4 }
 0x3c3   : > { %v538_v26 = vpack.c.bf16 %v537_v25, %v537_v25 }
 0x3c5   : > { %1068 = vmatmul.mubr.msk.bf16.vlgmr.msra.gmra.mrb[8].mxu0 %vm375_vm2, %v538_v26  ;;  %v743_v28 = vpop.xlane.xlu1 %742 }
 0x3c6   : > { %1078 = vmatpush3.bf16.msra.mxu0 %v646_v27  ;;  %1187 = vrcp.f32 %v743_v28  ;;  %1079 = vmatprep.mubr.msk.bf16.mxu0 %vm1326_vm0, %v1325_v0 }
 0x3c7   : > { %1089 = vmatprep.subr.bf16.mxu0 %v1325_v0 }
 0x3c8   : > { %v1186_v14 = vpop.eup %1185 }
 0x3c9   : > { %v641_v29 = vmul.f32 %v1186_v14, %v1178_v10  ;;  %v1012_v10 = vld [vmem:[%s1678_s4] ss:$0 sm:$0xff] }
 0x3cb   : > { %v642_v30 = vpack.c.bf16 %v641_v29, %v641_v29 }
 0x3cd   : > { %1080 = vmatmul.mubr.msk.bf16.vlgmr.msra.gmra.mrb[12].mxu0 %vm375_vm2, %v642_v30 }
 0x3ce   : > { %1090 = vmatpush3.bf16.msra.mxu0 %v750_v31  ;;  %1091 = vmatprep.mubr.msk.bf16.mxu0 %vm1326_vm0, %v1325_v0 }
 0x3d0   : > { %v1188_v16 = vpop.eup %1187 }
 0x3d1   : > { %v745_v32 = vmul.f32 %v1188_v16, %v1180_v12 }
 0x3d3   : > { %v746_v33 = vpack.c.bf16 %v745_v32, %v745_v32 }
 0x3d5   : > { %1092 = vmatmul.mubr.msk.bf16.vlgmr.msra.gmra.mrb[16].mxu0 %vm375_vm2, %v746_v33 }
 0x425   : > { %v473_v34 = vpop.f32.mrb[4].mxu0 }
 0x426   : > { %v1057_v35 = vpop.f32.mrb[5].mxu0 }
 0x427   : > { %v476_v36 = vpop.f32.mrb[6].mxu0 }
 0x428   : > { %v1058_v37 = vpop.f32.mrb[7].mxu0 }
 0x498   : > { %v578_v38 = vpop.f32.mrb[8].mxu0 }
 0x499   : > { %793 = vrot.lane.b32.xlu0 %v578_v38, %s1331_s7  ;;  %v1069_v39 = vpop.f32.mrb[9].mxu0  ;;  %s886_s7 = scalar_lea.sflag [#allocation4], %s1506_s26 }
 0x49a   : > { %v581_v40 = vpop.f32.mrb[10].mxu0 }
 0x49b   : > { %v1070_v41 = vpop.f32.mrb[11].mxu0 }
 0x4a0   : > { %v682_v18 = vpop.f32.mrb[12].mxu0 }
 0x4a1   : > { %797 = vrot.lane.b32.xlu1 %v682_v18, %s1332_s30  ;;  %v1081_v42 = vpop.f32.mrb[13].mxu0  ;;  %s1249_s30 = scalar_lea.vmem %s1631_s20, 128 }
 0x4a2   : > { %v685_v0 = vpop.f32.mrb[14].mxu0  ;;  %p1250_p6 = scmp.ne.s32.totalorder %s1631_s20, %s1249_s30 }
 0x4a3   : > { %v1082_v43 = vpop.f32.mrb[15].mxu0 }
 0x4a4   : > { %p1251_p8 = pnand %p1250_p6, %p1461_p12 }
 0x4a6   : > { %p1252_p10 = pneg %p1251_p8 }
 0x4a8   : > { %v786_v44 = vpop.f32.mrb[16].mxu0 }
 0x4a9   : > { %801 = vrot.lane.b32.xlu1 %v786_v44, %s1333_s16  ;;  %v1093_v45 = vpop.f32.mrb[17].mxu0  ;;  %s1255_s16 = scalar_lea.vmem %s1254_s12, 256 }
 0x4aa   : > { %v789_v46 = vpop.f32.mrb[18].mxu0  ;;  %p1257_p3 = scmp.lt.s32.totalorder %s1255_s16, %s1249_s30 }
 0x4ab   : > { %v1094_v47 = vpop.f32.mrb[19].mxu0 }
 0x4ac   : > { %p1258_p7 = por %p1257_p3, %p1256_p13 }
 0x4ae   : > { %p1259_p9 = pnand %p1258_p7, %p1252_p10 }
 0x50b   : > { %v794_v48 = vpop.permute.xlu0 %793 }
 0x50c   : > { %v804_v50 = vsel %vm375_vm2, %v473_v34, %v794_v48 }
 0x513   : > { %v798_v49 = vpop.permute.xlu1 %797 }
 0x514   : > { %v806_v51 = vsel %vm805_vm6, %v804_v50, %v798_v49 }
 0x51b   : > { %v802_v52 = vpop.permute.xlu1 %801 }
 0x51c   : > { %v808_v53 = vsel %vm807_vm7, %v806_v51, %v802_v52 }
 0x51d   : > { %v811_v54 = vpack.c.bf16 %v808_v53, %v808_v53 }
 0x51f   : > { %1100 = vmatmul.mubr.msk.bf16.vlgmr.msra.gmra.mrb[16].mxu1 %vm322_vm1, %v811_v54 }
 0x5f2   : > { %v849_v55 = vpop.f32.mrb[16].mxu1 }
 0x5f3   : > { %v850_v56 = vadd.f32 %v1538_v5, %v849_v55  ;;  %v1101_v57 = vpop.f32.mrb[17].mxu1 }
 0x5f4   : > { %v852_v58 = vpop.f32.mrb[18].mxu1 }
 0x5f5   : > { %v1102_v59 = vpop.f32.mrb[19].mxu1  ;;  %v855_v60 = vadd.f32 %v850_v56, %v1526_v3  ;;  %v1011_v3 = vld [vmem:[%s1677_s3] ss:$0 sm:$0xff] }
 0x5f7   : > { %v856_v61 = vsel %vm322_vm1, %v855_v60, 0.0 }
 0x5f8   : > { %857 = vadd.xlane.f32.xlu0 %v856_v61 }
 0x685   : > { %v858_v62 = vpop.xlane.xlu0 %857 }
 0x686   : > { %v860_v63 = vmul.f32 0.03125, %v858_v62 }
 0x688   : > { %v861_v1 = vsub.f32 %v855_v60, %v860_v63 }
 0x68a   : > { %v862_v2 = vmul.f32 %v861_v1, %v861_v1 }
 0x68c   : > { %v863_v4 = vsel %vm322_vm1, %v862_v2, 0.0 }
 0x68d   : > { %864 = vadd.xlane.f32.xlu1 %v863_v4 }
 0x71a   : > { %v865_v6 = vpop.xlane.xlu1 %864 }
 0x71b   : > { %v866_v5 = vmul.f32 0.03125, %v865_v6 }
 0x71d   : > { %v867_v7 = vadd.f32 1e-05, %v866_v5 }
 0x71f   : > { %1189 = vrsqrt.f32 %v867_v7 }
 0x729   : > { %v1190_v8 = vpop.eup %1189 }
 0x72a   : > { %v869_v9 = vmul.f32 %v1190_v8, %v861_v1 }
 0x72c   : > { %v876_v11 = vmul.f32 %v1011_v3, %v869_v9 }
 0x72e   : > { %v883_v12 = vadd.f32 %v1012_v10, %v876_v11 }
 0x730   : > { %884 = vst.msk [vmem:[%s292_s11] sm:$0xff] %vm322_vm1, %v883_v12 }
 0x731   : > { %1262 = shalt.err (!%p1259_p9)
}
 0x732   : > { %s1263_s26 = scalar_lea.hbm %s1629_s18, 128  ;;  %s1267_s29 = scalar_lea.hbm %s1680_s6, 256 }
 0x733   : > { %p1264_p2 = scmp.ne.s32.totalorder %s1629_s18, %s1263_s26  ;;  %p1268_p11 = scmp.lt.u32.totalorder %s1629_s18, %s1680_s6 }
 0x734   : > { %p1269_p1 = scmp.lt.u32.totalorder %s1267_s29, %s1263_s26  ;;  %p1271_p6 = scmp.lt.u32.totalorder %s1263_s26, %s1629_s18 }
 0x735   : > { %p1265_p5 = pnand %p1264_p2, %p1461_p12 }
 0x736   : > { %p1270_p4 = por %p1269_p1, %p1268_p11 }
 0x737   : > { %p1266_p0 = pneg %p1265_p5 }
 0x738   : > { %p1272_p8 = por %p1271_p6, %p1270_p4 }
 0x73a   : > { %p1273_p10 = pnand %p1272_p8, %p1266_p0 }
 0x73c   : > { %1276 = shalt.err (!%p1273_p10)
}
 0x73d   : > { %1109 = dma.vmem_to_hbm [thread:$0]  (%p1461_p12), %s1631_s20, 128, %s1629_s18, %s886_s7  }
 0x73e PF: > { %s911_s11 = sand.u32 1, %s1307_s21   ;;  %p1695_p13 = scmp.ne.s32.totalorder %s1685_s28, 0 }
 0x73f   : > { %p1696_p3 = scmp.ge.s32.totalorder %s1319_s24, 2  ;;  %s912_s8 = scalar_lea.sflag [#allocation4], %s911_s11 }
 0x741   : > { %p1120_p7 = pnand %p1696_p3, %p1695_p13 }
 0x743   : > { %1302 = dma.done.wait (!%p1120_p7), %s912_s8, 128  }
 0x744   : > { %1304 = vsyncadd (!%p1120_p7), %s912_s8, 4294967168  ;;  %p20_p9 = scmp.ge.s32.totalorder %s1426_s9, 4   ;;  %s1697_s21 = smov %s1311_s22 }
 0x745   : > { %s1698_s22 = smov %s1315_s23  ;;  %s1699_s23 = smov %s1457_s13 }
 0x746   : > { %s1700_s24 = smov %s1426_s9  ;;  %22 = sbr.rel (!%p20_p9) target bundleno = 6 (0x6), region = 96 }
 0x74d   :  { %917 = vsyncpa [#allocation3], 1 }
 0x74e   :  { %919 = vsyncpa [#allocation3 + $0x1], 1 }
 0x74f   :  { %920 = vsyncpa [#allocation6], 1 }
 0x750   :  { %921 = vsyncpa [#allocation4], 1 }
 0x751   :  { %923 = vsyncpa [#allocation4 + $0x1], 1 }

</bundles_post_ra>
